<compile_context>
chip_gen: v6e
topology: v6e:2x2x1
jax: 0.10.0
libtpu: 0.0.40
codegen_flags: <defaults>
</compile_context>

<pallas_src>
import jax
import jax.numpy as jnp
from jax import lax
from jax.experimental import pallas as pl
from jax.experimental.pallas import tpu as pltpu


# ----------------------------- Pallas kernel ------------------------------- #

def _make_block_kernel(h, w, th, cout):
    wc = w * cout

    def kernel(x_ref, m1_ref, b1_ref, m2_ref, b2_ref, o_ref, hs_ref):
        # x_ref : (1, H+2, (W+2)*Cin)   replicate-padded input rows, lanes = (col, chan)
        # m1_ref: (3, (W+2)*Cin, W*Cout) conv1 (BN folded) per-ky wide weights
        # b1_ref: (1, W*Cout)
        # m2_ref: (3, W*Cout, W*Cout)    conv2 per-ky wide weights (col clamp baked in)
        # b2_ref: (1, W*Cout)
        # o_ref : (1, TH, W*Cout)        lane-dense output row tile
        # hs_ref: VMEM scratch (H+16, W*Cout): conv1 output with 8-row replicated halo
        j = pl.program_id(1)

        @pl.when(j == 0)
        def _conv1_whole_image():
            acc = jnp.zeros((h, wc), jnp.float32)
            for ky in range(3):
                slab = x_ref[0, ky:ky + h, :]                 # (H, (W+2)*Cin)
                acc = acc + jnp.dot(slab, m1_ref[ky],
                                    preferred_element_type=jnp.float32)
            hrows = jnp.maximum(acc + b1_ref[...], 0.0)       # (H, W*Cout)
            # hs[m] = h[clamp(m - 8, 0, H-1)]  (8-row replicated halo, aligned stores)
            hs_ref[8:8 + h, :] = hrows
            hs_ref[0:8, :] = jnp.broadcast_to(hrows[0:1, :], (8, wc))
            hs_ref[8 + h:16 + h, :] = jnp.broadcast_to(hrows[h - 1:h, :], (8, wc))

        # conv2 + ReLU + residual on output rows [r0, r0 + TH)
        r0 = j * th
        acc2 = jnp.zeros((th, wc), jnp.float32)
        for ky in range(3):
            slab = hs_ref[pl.ds(r0 + ky + 7, th), :]          # h rows clamp(y+ky-1)
            acc2 = acc2 + jnp.dot(slab, m2_ref[ky],
                                  preferred_element_type=jnp.float32)
        res = hs_ref[pl.ds(r0 + 8, th), :]                    # residual = conv1 output
        o_ref[0] = (jnp.maximum(acc2 + b2_ref[...], 0.0) + res).astype(o_ref.dtype)

    return kernel


# ------------------------------ JAX wrapper --------------------------------- #

def block_forward(x_nchw, w1, b1, w2, b2, gamma, beta, eps=1e-5):
    n, cin, h, w = x_nchw.shape
    cout = w1.shape[0]
    assert h % 8 == 0, "row-tiled path assumes H % 8 == 0"  # TODO(synk): general H
    th = 8
    wc = w * cout
    x32 = x_nchw.astype(jnp.float32)

    # BatchNorm2d in training mode (module default): batch stats, biased variance.
    # TODO(synk): the mean/var reduction is plain-JAX glue; it is folded into conv1's
    # weights/bias below so no BN work remains inside the kernel.
    mean = jnp.mean(x32, axis=(0, 2, 3))
    var = jnp.mean((x32 - mean[None, :, None, None]) ** 2, axis=(0, 2, 3))
    s = gamma.astype(jnp.float32) / jnp.sqrt(var + eps)
    t = beta.astype(jnp.float32) - mean * s
    w1f = w1.astype(jnp.float32) * s[None, :, None, None]
    b1f = b1.astype(jnp.float32) + jnp.einsum('ocyx,c->o', w1.astype(jnp.float32), t)

    # Host layout: NHWC, replicate-pad by 1, flatten rows over (col, chan).
    xn = jnp.transpose(x32, (0, 2, 3, 1))                               # (N, H, W, Cin)
    xp = jnp.pad(xn, ((0, 0), (1, 1), (1, 1), (0, 0)), mode="edge")     # (N,H+2,W+2,Cin)
    x_wide = xp.reshape(n, h + 2, (w + 2) * cin)

    # Block-banded "wide" weight matrices (3x3 column shifts + channel mixing folded
    # into the matmul; conv2's replicate column clamp baked into M2).
    w1t = jnp.transpose(w1f, (2, 3, 1, 0))                    # (ky, kx, Cin, Cout)
    w2t = jnp.transpose(w2.astype(jnp.float32), (2, 3, 1, 0)) # (ky, kx, Cout, Cout)
    kk = jnp.arange(3)[:, None, None]
    xx = jnp.arange(w)[None, None, :]
    jj = jnp.arange(w + 2)[None, :, None]
    ssd = jnp.arange(w)[None, :, None]
    A = (jj == xx + kk).astype(jnp.float32)                           # (3, W+2, W)
    B = (ssd == jnp.clip(xx + kk - 1, 0, w - 1)).astype(jnp.float32)  # (3, W,   W)
    m1 = jnp.einsum('kjx,ykco->yjcxo', A, w1t).reshape(3, (w + 2) * cin, wc)
    m2 = jnp.einsum('ksx,ykco->yscxo', B, w2t).reshape(3, wc, wc)
    b1w = jnp.tile(b1f, w).reshape(1, wc)
    b2w = jnp.tile(b2.astype(jnp.float32), w).reshape(1, wc)

    kernel = _make_block_kernel(h, w, th, cout)
    out_wide = pl.pallas_call(
        kernel,
        out_shape=jax.ShapeDtypeStruct((n, h, wc), jnp.float32),
        grid=(n, h // th),
        in_specs=[
            pl.BlockSpec((1, h + 2, (w + 2) * cin), lambda i, j: (i, 0, 0)),
            pl.BlockSpec((3, (w + 2) * cin, wc), lambda i, j: (0, 0, 0)),
            pl.BlockSpec((1, wc), lambda i, j: (0, 0)),
            pl.BlockSpec((3, wc, wc), lambda i, j: (0, 0, 0)),
            pl.BlockSpec((1, wc), lambda i, j: (0, 0)),
        ],
        out_specs=pl.BlockSpec((1, th, wc), lambda i, j: (i, j, 0)),
        scratch_shapes=[pltpu.VMEM((h + 16, wc), jnp.float32)],
        compiler_params=pltpu.CompilerParams(
            dimension_semantics=("parallel", "arbitrary")),
    )(x_wide, m1, b1w, m2, b2w)

    out = out_wide.reshape(n, h, w, cout)
    return jnp.transpose(out, (0, 3, 1, 2))                             # NCHW


block_forward_jit = jax.jit(block_forward)


# --------------------------- pure-JAX reference ----------------------------- #

def _ref_conv_replicate(x_nchw, w, b):
    xp = jnp.pad(x_nchw, ((0, 0), (0, 0), (1, 1), (1, 1)), mode="edge")
    y = lax.conv_general_dilated(
        xp, w, window_strides=(1, 1), padding="VALID",
        dimension_numbers=("NCHW", "OIHW", "NCHW"))
    return y + b[None, :, None, None]


def ref_forward(x, w1, b1, w2, b2, gamma, beta, eps=1e-5):
    mean = jnp.mean(x, axis=(0, 2, 3))
    var = jnp.mean((x - mean[None, :, None, None]) ** 2, axis=(0, 2, 3))
    xn = (x - mean[None, :, None, None]) / jnp.sqrt(var + eps)[None, :, None, None]
    xn = xn * gamma[None, :, None, None] + beta[None, :, None, None]
    hh = jnp.maximum(_ref_conv_replicate(xn, w1, b1), 0.0)
    return jnp.maximum(_ref_conv_replicate(hh, w2, b2), 0.0) + hh


# --------------------------------- main ------------------------------------ #

if __name__ == "__main__":
    key = jax.random.PRNGKey(0)
    n, cin, hh, ww = 2, 4, 16, 16
    cout = 8
    ks = jax.random.split(key, 7)

    x = jax.random.normal(ks[0], (n, cin, hh, ww), jnp.float32)
    w1 = 0.1 * jax.random.normal(ks[1], (cout, cin, 3, 3), jnp.float32)
    b1 = 0.1 * jax.random.normal(ks[2], (cout,), jnp.float32)
    w2 = 0.1 * jax.random.normal(ks[3], (cout, cout, 3, 3), jnp.float32)
    b2 = 0.1 * jax.random.normal(ks[4], (cout,), jnp.float32)
    gamma = 1.0 + 0.1 * jax.random.normal(ks[5], (cin,), jnp.float32)
    beta = 0.1 * jax.random.normal(ks[6], (cin,), jnp.float32)

    out = block_forward_jit(x, w1, b1, w2, b2, gamma, beta)
    out = jax.block_until_ready(out)

    ref = ref_forward(x, w1, b1, w2, b2, gamma, beta)
    err = float(jnp.max(jnp.abs(out - ref)))
    assert out.shape == (n, cout, hh, ww), out.shape
    assert err < 1e-3, f"max abs err {err}"
    print("KERNEL_OK")
</pallas_src>

<mosaic_0001>
module attributes {stable_mosaic.version = 11 : i64} {
  func.func @kernel(%arg0: i32, %arg1: i32, %arg2: memref<1x18x72xf32, #tpu.memory_space<vmem>>, %arg3: memref<3x72x128xf32, #tpu.memory_space<vmem>>, %arg4: memref<1x128xf32, #tpu.memory_space<vmem>>, %arg5: memref<3x128x128xf32, #tpu.memory_space<vmem>>, %arg6: memref<1x128xf32, #tpu.memory_space<vmem>>, %arg7: memref<1x8x128xf32, #tpu.memory_space<vmem>>, %arg8: memref<32x128xf32, #tpu.memory_space<vmem>>) attributes {dimension_semantics = [#tpu.dimension_semantics<parallel>, #tpu.dimension_semantics<arbitrary>], iteration_bounds = array<i64: 2, 2>, scalar_prefetch = 0 : i64, scratch_operands = 1 : i64, tpu.core_type = #tpu.core_type<tc>, window_params = [{transform_indices = @transform_0, window_bounds = array<i64: 1, 18, 72>}, {pipeline_mode = #tpu.pipeline_mode<synchronous>, transform_indices = @transform_1, window_bounds = array<i64: 3, 72, 128>}, {pipeline_mode = #tpu.pipeline_mode<synchronous>, transform_indices = @transform_2, window_bounds = array<i64: 1, 128>}, {pipeline_mode = #tpu.pipeline_mode<synchronous>, transform_indices = @transform_3, window_bounds = array<i64: 3, 128, 128>}, {pipeline_mode = #tpu.pipeline_mode<synchronous>, transform_indices = @transform_4, window_bounds = array<i64: 1, 128>}, {transform_indices = @transform_5, window_bounds = array<i64: 1, 8, 128>}]} {
    %c0_i32 = arith.constant 0 : i32
    %0 = arith.cmpi eq, %arg1, %c0_i32 : i32
    %1 = arith.extui %0 : i1 to i32
    %c0_i32_0 = arith.constant 0 : i32
    %2 = arith.cmpi ne, %1, %c0_i32_0 : i32
    scf.if %2 {
      %cst_24 = arith.constant 0.000000e+00 : f32
      %41 = vector.broadcast %cst_24 : f32 to vector<16x128xf32>
      %c0_25 = arith.constant 0 : index
      %c0_26 = arith.constant 0 : index
      %c0_27 = arith.constant 0 : index
      %42 = vector.load %arg2[%c0_25, %c0_26, %c0_27] : memref<1x18x72xf32, #tpu.memory_space<vmem>>, vector<1x16x72xf32>
      %43 = vector.shape_cast %42 : vector<1x16x72xf32> to vector<16x72xf32>
      %c0_28 = arith.constant 0 : index
      %c0_29 = arith.constant 0 : index
      %c0_30 = arith.constant 0 : index
      %44 = vector.load %arg3[%c0_28, %c0_29, %c0_30] : memref<3x72x128xf32, #tpu.memory_space<vmem>>, vector<1x72x128xf32>
      %45 = vector.shape_cast %44 : vector<1x72x128xf32> to vector<72x128xf32>
      %cst_31 = arith.constant dense<0.000000e+00> : vector<16x128xf32>
      %46 = tpu.matmul %43, %45, %cst_31 {dimension_numbers = #tpu.dot_dimension_numbers<[1], [0], [0], [1], [0, 0, 1, 1], [], []>} : vector<16x72xf32>, vector<72x128xf32>, vector<16x128xf32> -> vector<16x128xf32>
      %47 = arith.addf %41, %46 : vector<16x128xf32>
      %c0_32 = arith.constant 0 : index
      %c1_33 = arith.constant 1 : index
      %c0_34 = arith.constant 0 : index
      %48 = vector.load %arg2[%c0_32, %c1_33, %c0_34] : memref<1x18x72xf32, #tpu.memory_space<vmem>>, vector<1x16x72xf32>
      %49 = vector.shape_cast %48 : vector<1x16x72xf32> to vector<16x72xf32>
      %c1_35 = arith.constant 1 : index
      %c0_36 = arith.constant 0 : index
      %c0_37 = arith.constant 0 : index
      %50 = vector.load %arg3[%c1_35, %c0_36, %c0_37] : memref<3x72x128xf32, #tpu.memory_space<vmem>>, vector<1x72x128xf32>
      %51 = vector.shape_cast %50 : vector<1x72x128xf32> to vector<72x128xf32>
      %cst_38 = arith.constant dense<0.000000e+00> : vector<16x128xf32>
      %52 = tpu.matmul %49, %51, %cst_38 {dimension_numbers = #tpu.dot_dimension_numbers<[1], [0], [0], [1], [0, 0, 1, 1], [], []>} : vector<16x72xf32>, vector<72x128xf32>, vector<16x128xf32> -> vector<16x128xf32>
      %53 = arith.addf %47, %52 : vector<16x128xf32>
      %c0_39 = arith.constant 0 : index
      %c2_40 = arith.constant 2 : index
      %c0_41 = arith.constant 0 : index
      %54 = vector.load %arg2[%c0_39, %c2_40, %c0_41] : memref<1x18x72xf32, #tpu.memory_space<vmem>>, vector<1x16x72xf32>
      %55 = vector.shape_cast %54 : vector<1x16x72xf32> to vector<16x72xf32>
      %c2_42 = arith.constant 2 : index
      %c0_43 = arith.constant 0 : index
      %c0_44 = arith.constant 0 : index
      %56 = vector.load %arg3[%c2_42, %c0_43, %c0_44] : memref<3x72x128xf32, #tpu.memory_space<vmem>>, vector<1x72x128xf32>
      %57 = vector.shape_cast %56 : vector<1x72x128xf32> to vector<72x128xf32>
      %cst_45 = arith.constant dense<0.000000e+00> : vector<16x128xf32>
      %58 = tpu.matmul %55, %57, %cst_45 {dimension_numbers = #tpu.dot_dimension_numbers<[1], [0], [0], [1], [0, 0, 1, 1], [], []>} : vector<16x72xf32>, vector<72x128xf32>, vector<16x128xf32> -> vector<16x128xf32>
      %59 = arith.addf %53, %58 : vector<16x128xf32>
      %c0_46 = arith.constant 0 : index
      %c0_47 = arith.constant 0 : index
      %60 = vector.load %arg4[%c0_46, %c0_47] : memref<1x128xf32, #tpu.memory_space<vmem>>, vector<1x128xf32>
      %61 = vector.broadcast %60 : vector<1x128xf32> to vector<16x128xf32>
      %62 = arith.addf %59, %61 : vector<16x128xf32>
      %cst_48 = arith.constant 0.000000e+00 : f32
      %63 = vector.broadcast %cst_48 : f32 to vector<16x128xf32>
      %64 = arith.maximumf %62, %63 : vector<16x128xf32>
      %c8 = arith.constant 8 : index
      %c0_49 = arith.constant 0 : index
      %65 = vector.load %arg8[%c8, %c0_49] : memref<32x128xf32, #tpu.memory_space<vmem>>, vector<16x128xf32>
      tpu.vector_store %arg8[%c8, %c0_49], %64 {strides = array<i32>} : memref<32x128xf32, #tpu.memory_space<vmem>>, vector<16x128xf32>,
      %66 = vector.extract_strided_slice %64 {offsets = [0, 0], sizes = [1, 128], strides = [1, 1]} : vector<16x128xf32> to vector<1x128xf32>
      %67 = vector.shape_cast %66 : vector<1x128xf32> to vector<1x128xf32>
      %68 = vector.broadcast %67 : vector<1x128xf32> to vector<8x128xf32>
      %c0_50 = arith.constant 0 : index
      %c0_51 = arith.constant 0 : index
      %69 = vector.load %arg8[%c0_50, %c0_51] : memref<32x128xf32, #tpu.memory_space<vmem>>, vector<8x128xf32>
      tpu.vector_store %arg8[%c0_50, %c0_51], %68 {strides = array<i32>} : memref<32x128xf32, #tpu.memory_space<vmem>>, vector<8x128xf32>,
      %70 = vector.extract_strided_slice %64 {offsets = [15, 0], sizes = [1, 128], strides = [1, 1]} : vector<16x128xf32> to vector<1x128xf32>
      %71 = vector.shape_cast %70 : vector<1x128xf32> to vector<1x128xf32>
      %72 = vector.broadcast %71 : vector<1x128xf32> to vector<8x128xf32>
      %c24 = arith.constant 24 : index
      %c0_52 = arith.constant 0 : index
      %73 = vector.load %arg8[%c24, %c0_52] : memref<32x128xf32, #tpu.memory_space<vmem>>, vector<8x128xf32>
      tpu.vector_store %arg8[%c24, %c0_52], %72 {strides = array<i32>} : memref<32x128xf32, #tpu.memory_space<vmem>>, vector<8x128xf32>,
    } else {
    }
    %c8_i32 = arith.constant 8 : i32
    %3 = arith.muli %arg1, %c8_i32 : i32
    %cst = arith.constant 0.000000e+00 : f32
    %4 = vector.broadcast %cst : f32 to vector<8x128xf32>
    %c0_i32_1 = arith.constant 0 : i32
    %5 = arith.addi %3, %c0_i32_1 : i32
    %c7_i32 = arith.constant 7 : i32
    %6 = arith.addi %5, %c7_i32 : i32
    %7 = arith.index_cast %6 : i32 to index
    %c0 = arith.constant 0 : index
    %8 = vector.load %arg8[%7, %c0] : memref<32x128xf32, #tpu.memory_space<vmem>>, vector<8x128xf32>
    %c0_2 = arith.constant 0 : index
    %c0_3 = arith.constant 0 : index
    %c0_4 = arith.constant 0 : index
    %9 = vector.load %arg5[%c0_2, %c0_3, %c0_4] : memref<3x128x128xf32, #tpu.memory_space<vmem>>, vector<1x128x128xf32>
    %10 = vector.shape_cast %9 : vector<1x128x128xf32> to vector<128x128xf32>
    %cst_5 = arith.constant dense<0.000000e+00> : vector<8x128xf32>
    %11 = tpu.matmul %8, %10, %cst_5 {dimension_numbers = #tpu.dot_dimension_numbers<[1], [0], [0], [1], [0, 0, 1, 1], [], []>} : vector<8x128xf32>, vector<128x128xf32>, vector<8x128xf32> -> vector<8x128xf32>
    %12 = arith.addf %4, %11 : vector<8x128xf32>
    %c1_i32 = arith.constant 1 : i32
    %13 = arith.addi %3, %c1_i32 : i32
    %c7_i32_6 = arith.constant 7 : i32
    %14 = arith.addi %13, %c7_i32_6 : i32
    %15 = arith.index_cast %14 : i32 to index
    %c0_7 = arith.constant 0 : index
    %16 = vector.load %arg8[%15, %c0_7] : memref<32x128xf32, #tpu.memory_space<vmem>>, vector<8x128xf32>
    %c1 = arith.constant 1 : index
    %c0_8 = arith.constant 0 : index
    %c0_9 = arith.constant 0 : index
    %17 = vector.load %arg5[%c1, %c0_8, %c0_9] : memref<3x128x128xf32, #tpu.memory_space<vmem>>, vector<1x128x128xf32>
    %18 = vector.shape_cast %17 : vector<1x128x128xf32> to vector<128x128xf32>
    %cst_10 = arith.constant dense<0.000000e+00> : vector<8x128xf32>
    %19 = tpu.matmul %16, %18, %cst_10 {dimension_numbers = #tpu.dot_dimension_numbers<[1], [0], [0], [1], [0, 0, 1, 1], [], []>} : vector<8x128xf32>, vector<128x128xf32>, vector<8x128xf32> -> vector<8x128xf32>
    %20 = arith.addf %12, %19 : vector<8x128xf32>
    %c2_i32 = arith.constant 2 : i32
    %21 = arith.addi %3, %c2_i32 : i32
    %c7_i32_11 = arith.constant 7 : i32
    %22 = arith.addi %21, %c7_i32_11 : i32
    %23 = arith.index_cast %22 : i32 to index
    %c0_12 = arith.constant 0 : index
    %24 = vector.load %arg8[%23, %c0_12] : memref<32x128xf32, #tpu.memory_space<vmem>>, vector<8x128xf32>
    %c2 = arith.constant 2 : index
    %c0_13 = arith.constant 0 : index
    %c0_14 = arith.constant 0 : index
    %25 = vector.load %arg5[%c2, %c0_13, %c0_14] : memref<3x128x128xf32, #tpu.memory_space<vmem>>, vector<1x128x128xf32>
    %26 = vector.shape_cast %25 : vector<1x128x128xf32> to vector<128x128xf32>
    %cst_15 = arith.constant dense<0.000000e+00> : vector<8x128xf32>
    %27 = tpu.matmul %24, %26, %cst_15 {dimension_numbers = #tpu.dot_dimension_numbers<[1], [0], [0], [1], [0, 0, 1, 1], [], []>} : vector<8x128xf32>, vector<128x128xf32>, vector<8x128xf32> -> vector<8x128xf32>
    %28 = arith.addf %20, %27 : vector<8x128xf32>
    %c8_i32_16 = arith.constant 8 : i32
    %29 = arith.addi %3, %c8_i32_16 : i32
    %30 = arith.index_cast %29 : i32 to index
    %c0_17 = arith.constant 0 : index
    %31 = vector.load %arg8[%30, %c0_17] : memref<32x128xf32, #tpu.memory_space<vmem>>, vector<8x128xf32>
    %c0_18 = arith.constant 0 : index
    %c0_19 = arith.constant 0 : index
    %32 = vector.load %arg6[%c0_18, %c0_19] : memref<1x128xf32, #tpu.memory_space<vmem>>, vector<1x128xf32>
    %33 = vector.broadcast %32 : vector<1x128xf32> to vector<8x128xf32>
    %34 = arith.addf %28, %33 : vector<8x128xf32>
    %cst_20 = arith.constant 0.000000e+00 : f32
    %35 = vector.broadcast %cst_20 : f32 to vector<8x128xf32>
    %36 = arith.maximumf %34, %35 : vector<8x128xf32>
    %37 = arith.addf %36, %31 : vector<8x128xf32>
    %c0_21 = arith.constant 0 : index
    %c0_22 = arith.constant 0 : index
    %c0_23 = arith.constant 0 : index
    %38 = vector.load %arg7[%c0_21, %c0_22, %c0_23] : memref<1x8x128xf32, #tpu.memory_space<vmem>>, vector<1x8x128xf32>
    %39 = vector.shape_cast %38 : vector<1x8x128xf32> to vector<8x128xf32>
    %40 = vector.shape_cast %37 : vector<8x128xf32> to vector<1x8x128xf32>
    tpu.vector_store %arg7[%c0_21, %c0_22, %c0_23], %40 {strides = array<i32>} : memref<1x8x128xf32, #tpu.memory_space<vmem>>, vector<1x8x128xf32>,
    return
  }
  func.func @transform_0(%arg0: i32, %arg1: i32) -> (i32, i32, i32) {
    %c0_i32 = arith.constant 0 : i32
    %c0_i32_0 = arith.constant 0 : i32
    %c0_i32_1 = arith.constant 0 : i32
    return %arg0, %c0_i32, %c0_i32_0 : i32, i32, i32
  }
  func.func @transform_1(%arg0: i32, %arg1: i32) -> (i32, i32, i32) {
    %c0_i32 = arith.constant 0 : i32
    %c0_i32_0 = arith.constant 0 : i32
    %c0_i32_1 = arith.constant 0 : i32
    %c0_i32_2 = arith.constant 0 : i32
    return %c0_i32, %c0_i32_0, %c0_i32_1 : i32, i32, i32
  }
  func.func @transform_2(%arg0: i32, %arg1: i32) -> (i32, i32) {
    %c0_i32 = arith.constant 0 : i32
    %c0_i32_0 = arith.constant 0 : i32
    %c0_i32_1 = arith.constant 0 : i32
    return %c0_i32, %c0_i32_0 : i32, i32
  }
  func.func @transform_3(%arg0: i32, %arg1: i32) -> (i32, i32, i32) {
    %c0_i32 = arith.constant 0 : i32
    %c0_i32_0 = arith.constant 0 : i32
    %c0_i32_1 = arith.constant 0 : i32
    %c0_i32_2 = arith.constant 0 : i32
    return %c0_i32, %c0_i32_0, %c0_i32_1 : i32, i32, i32
  }
  func.func @transform_4(%arg0: i32, %arg1: i32) -> (i32, i32) {
    %c0_i32 = arith.constant 0 : i32
    %c0_i32_0 = arith.constant 0 : i32
    %c0_i32_1 = arith.constant 0 : i32
    return %c0_i32, %c0_i32_0 : i32, i32
  }
  func.func @transform_5(%arg0: i32, %arg1: i32) -> (i32, i32, i32) {
    %c0_i32 = arith.constant 0 : i32
    %c0_i32_0 = arith.constant 0 : i32
    return %arg0, %arg1, %c0_i32 : i32, i32, i32
  }
}

</mosaic_0001>

<bundles_post_ra>
// kernel: tile.13
= control target key start
LH: loop header
LB: loop body
LE: loop exit
PB: predicated region body
PF: predicated region fallthrough
CT: control target
= control target key end

     0   :  { %s28_s0 = inlined_call_operand.vmem [shape: f32[8], index: 0, kind: input, shape index: {}]   ;;  %s29_s1 = inlined_call_operand.vmem [shape: f32[16,8], index: 1, kind: output, shape index: {}]  }
   0x1   :  { %v4_v0 = vld [vmem:[%s28_s0] ss:$0 sm:$0xff] }
   0x2   :  { %5 = vst [vmem:[%s29_s1] sm:$0xff] %v4_v0  ;;  %8 = vst [vmem:[%s29_s1 + $0x8] sm:$0xff] %v4_v0 }

// kernel: tile.14
= control target key start
LH: loop header
LB: loop body
LE: loop exit
PB: predicated region body
PF: predicated region fallthrough
CT: control target
= control target key end

     0   :  { %s133_s10 = smov 120   ;;  %s134_s11 = smov 104   ;;  %vm3_vm0 = vcmask 64512   ;;  %vm9_vm1 = vcmask 1048512   ;;  %vm15_vm2 = vcmask 982912   ;;  %vm21_vm3 = vcmask 917312   ;;  %s209_s0 = inlined_call_operand.vmem [shape: f32[16,8], index: 0, kind: input, shape index: {}]   ;;  %s210_s1 = inlined_call_operand.vmem [shape: f32[1,128], index: 1, kind: output, shape index: {}]  }
   0x1   :  { %v103_v0 = vld [vmem:[%s209_s0 + $0xf] sm:$0x1]   ;;  %v105_v1 = vld [vmem:[%s209_s0 + $0xd] sm:$0x1]   ;;  %v104_v2 = vld [vmem:[%s209_s0 + $0xe] sm:$0x1]  }
   0x2   :  { %7 = vrot.lane.b32.xlu0 %v103_v0, %s133_s10  ;;  %19 = vrot.lane.b32.xlu1 %v105_v1, %s134_s11  ;;  %v106_v3 = vld [vmem:[%s209_s0 + $0xc] sm:$0x1]   ;;  %s135_s16 = smov 112   ;;  %s136_s17 = smov 96   ;;  %v107_v4 = vld [vmem:[%s209_s0 + $0xb] sm:$0x1]  }
   0x3   :  { %v108_v5 = vld [vmem:[%s209_s0 + $0xa] sm:$0x1]   ;;  %v2_v6 = vld [vmem:[%s209_s0] sm:$0x1]   ;;  %s137_s24 = smov 88   ;;  %s138_s25 = smov 80  }
   0x4   :  { %4 = vst.msk [vmem:[#allocation0] sm:$0x1] %vm3_vm0, %v2_v6   ;;  %v109_v7 = vld [vmem:[%s209_s0 + $0x9] sm:$0x1]   ;;  %v110_v8 = vld [vmem:[%s209_s0 + $0x8] sm:$0x1]  }
   0x5   :  { %s139_s30 = smov 72   ;;  %s140_s2 = smov 64   ;;  %v111_v9 = vld [vmem:[%s209_s0 + $0x7] sm:$0x1]   ;;  %v112_v10 = vld [vmem:[%s209_s0 + $0x6] sm:$0x1]  }
   0x6   :  { %13 = vrot.lane.b32.xlu0 %v104_v2, %s135_s16  ;;  %25 = vrot.lane.b32.xlu1 %v106_v3, %s136_s17  ;;  %s141_s7 = smov 56   ;;  %s142_s8 = smov 48   ;;  %v113_v11 = vld [vmem:[%s209_s0 + $0x5] sm:$0x1]   ;;  %v114_v12 = vld [vmem:[%s209_s0 + $0x4] sm:$0x1]  }
   0x7   :  { %s143_s13 = smov 40   ;;  %s144_s14 = smov 32   ;;  %v115_v13 = vld [vmem:[%s209_s0 + $0x3] sm:$0x1]   ;;  %v116_v14 = vld [vmem:[%s209_s0 + $0x2] sm:$0x1]  }
   0x8   :  { %s145_s19 = smov 24   ;;  %s146_s20 = smov 16   ;;  %v117_v15 = vld [vmem:[%s209_s0 + $0x1] sm:$0x1]   ;;  %vm27_vm4 = vcmask 851712   ;;  %vm33_vm5 = vcmask 786112  }
   0x9   :  { %s147_s0 = smov 8   ;;  %vm39_vm6 = vcmask 720512   ;;  %vm45_vm7 = vcmask 654912   ;;  %vm51_vm8 = vcmask 589312   ;;  %vm57_vm9 = vcmask 523712  }
   0xa   :  { %31 = vrot.lane.b32.xlu0 %v107_v4, %s137_s24  ;;  %37 = vrot.lane.b32.xlu1 %v108_v5, %s138_s25  ;;  %vm63_vm10 = vcmask 458112   ;;  %vm69_vm11 = vcmask 392512   ;;  %vm75_vm12 = vcmask 326912   ;;  %vm81_vm13 = vcmask 261312  }
   0xb   :  { %vm87_vm14 = vcmask 195712   ;;  %vm93_vm15 = vcmask 130112  }
   0xe   :  { %43 = vrot.lane.b32.xlu0 %v109_v7, %s139_s30  ;;  %49 = vrot.lane.b32.xlu1 %v110_v8, %s140_s2 }
  0x12   :  { %55 = vrot.lane.b32.xlu0 %v111_v9, %s141_s7  ;;  %61 = vrot.lane.b32.xlu1 %v112_v10, %s142_s8 }
  0x16   :  { %67 = vrot.lane.b32.xlu0 %v113_v11, %s143_s13  ;;  %73 = vrot.lane.b32.xlu1 %v114_v12, %s144_s14 }
  0x1a   :  { %79 = vrot.lane.b32.xlu0 %v115_v13, %s145_s19  ;;  %85 = vrot.lane.b32.xlu1 %v116_v14, %s146_s20 }
  0x1e   :  { %91 = vrot.lane.b32.xlu0 %v117_v15, %s147_s0 }
  0x74   :  { %v8_v16 = vpop.permute.xlu0 %7   ;;  %v20_v17 = vpop.permute.xlu1 %19  }
  0x75   :  { %10 = vst.msk [vmem:[#allocation0] sm:$0x1] %vm9_vm1, %v8_v16  }
  0x78   :  { %v14_v18 = vpop.permute.xlu0 %13   ;;  %v26_v19 = vpop.permute.xlu1 %25  }
  0x79   :  { %16 = vst.msk [vmem:[#allocation0] sm:$0x1] %vm15_vm2, %v14_v18  }
  0x7a   :  { %22 = vst.msk [vmem:[#allocation0] sm:$0x1] %vm21_vm3, %v20_v17  }
  0x7b   :  { %28 = vst.msk [vmem:[#allocation0] sm:$0x1] %vm27_vm4, %v26_v19  }
  0x7c   :  { %v32_v20 = vpop.permute.xlu0 %31   ;;  %v38_v21 = vpop.permute.xlu1 %37  }
  0x7d   :  { %34 = vst.msk [vmem:[#allocation0] sm:$0x1] %vm33_vm5, %v32_v20  }
  0x7e   :  { %40 = vst.msk [vmem:[#allocation0] sm:$0x1] %vm39_vm6, %v38_v21  }
  0x80   :  { %v44_v22 = vpop.permute.xlu0 %43   ;;  %v50_v23 = vpop.permute.xlu1 %49  }
  0x81   :  { %46 = vst.msk [vmem:[#allocation0] sm:$0x1] %vm45_vm7, %v44_v22  }
  0x82   :  { %52 = vst.msk [vmem:[#allocation0] sm:$0x1] %vm51_vm8, %v50_v23  }
  0x84   :  { %v56_v24 = vpop.permute.xlu0 %55   ;;  %v62_v25 = vpop.permute.xlu1 %61  }
  0x85   :  { %58 = vst.msk [vmem:[#allocation0] sm:$0x1] %vm57_vm9, %v56_v24  }
  0x86   :  { %64 = vst.msk [vmem:[#allocation0] sm:$0x1] %vm63_vm10, %v62_v25  }
  0x88   :  { %v68_v26 = vpop.permute.xlu0 %67   ;;  %v74_v27 = vpop.permute.xlu1 %73  }
  0x89   :  { %70 = vst.msk [vmem:[#allocation0] sm:$0x1] %vm69_vm11, %v68_v26  }
  0x8a   :  { %76 = vst.msk [vmem:[#allocation0] sm:$0x1] %vm75_vm12, %v74_v27  }
  0x8c   :  { %v80_v28 = vpop.permute.xlu0 %79   ;;  %v86_v29 = vpop.permute.xlu1 %85  }
  0x8d   :  { %82 = vst.msk [vmem:[#allocation0] sm:$0x1] %vm81_vm13, %v80_v28  }
  0x8e   :  { %88 = vst.msk [vmem:[#allocation0] sm:$0x1] %vm87_vm14, %v86_v29  }
  0x90   :  { %v92_v30 = vpop.permute.xlu0 %91  }
  0x91   :  { %94 = vst.msk [vmem:[#allocation0] sm:$0x1] %vm93_vm15, %v92_v30  }
  0x98   :  { %v99_v31 = vld [vmem:[#allocation0] sm:$0x1] }
  0x99   :  { %102 = vst [vmem:[%s210_s1] sm:$0x1] %v99_v31 }

// kernel: block_forward.1
= control target key start
LH: loop header
LB: loop body
LE: loop exit
PB: predicated region body
PF: predicated region fallthrough
CT: control target
= control target key end

     0   :  { %s1366_s18 = smov 0   ;;  %s1368_s19 = smov 0   ;;  %s1731_s0 = inlined_call_operand.vmem [shape: f32[2,18,72], index: 0, kind: input, shape index: {}]   ;;  %s1732_s1 = inlined_call_operand.vmem [shape: f32[3,72,128], index: 1, kind: input, shape index: {}]   ;;  %s1733_s2 = inlined_call_operand.vmem [shape: f32[1,128], index: 2, kind: input, shape index: {}]   ;;  %s1734_s3 = inlined_call_operand.vmem [shape: f32[3,128,128], index: 3, kind: input, shape index: {}]   ;;  %s1735_s4 = inlined_call_operand.vmem [shape: f32[1,128], index: 4, kind: input, shape index: {}]   ;;  %s1736_s5 = inlined_call_operand.vmem [shape: f32[2,16,128], index: 5, kind: output, shape index: {}]  }
   0x1   :  { %s1370_s20 = smov 0   ;;  %s1372_s21 = smov 0  }
   0x2   :  { %s1374_s22 = smov 0  }
   0x3 LB: > { %s24_s23 = sadd.s32 1, %s1324_s20  ;;  %s27_s24 = sadd.s32 1, %s1328_s21  ;;  %s1332_s22 = sphi %s1374_s22, %s15_s22   ;;  %s1328_s21 = sphi %s1372_s21, %s1740_s21   ;;  %s1324_s20 = sphi %s1370_s20, %s1739_s20   ;;  %s1320_s19 = sphi %s1368_s19, %s1738_s19   ;;  %s1316_s18 = sphi %s1366_s18, %s1737_s18  }
   0x4   : > { %p25_p0 = scmp.ge.s32.totalorder %s24_s23, 2  ;;  %p928_p1 = scmp.ge.s32.totalorder %s1332_s22, 1 }
   0x5   : > { %p201_p2 = scmp.lt.s32.totalorder %s1332_s22, 5 }
   0x6   : > { %s1742_s23 = smov (%p25_p0, %s24_s23), 0  ;;  %s1744_s24 = smov (!%p25_p0, %s27_s24), %s1328_s21 }
   0x7   : > { %p202_p3 = pnand %p928_p1, %p201_p2  ;;  %p29_p4 = scmp.ge.s32.totalorder %s1744_s24, 2 }
   0x8   : > { %p232_p5 = scmp.lt.s32.totalorder (!%p202_p3), %s1320_s19, 1  ;;  %p239_p6 = scmp.lt.s32.totalorder (!%p202_p3), %s1316_s18, 1 }
   0x9   : > { %s1746_s24 = smov (%p29_p4, %s1744_s24), 0  ;;  %205 = sbr.rel (%p202_p3) target bundleno = 533 (0x215), region = 40 }
   0xa   : > { %p932_p7 = scmp.ne.s32.totalorder (!%p202_p3), %s1316_s18, 0 }
   0xe   : > { %s1748_s19 = smov (!%p232_p5, %s1320_s19), 1 }
   0xf   : > { %s240_s25 = scalar_select %p239_p6, %s1316_s18, 1 }
  0x10   : > { %s1251_s26 = smul.u32 24, %s1748_s19  ;;  %s930_s27 = sshll.u32 %s1748_s19, 1 }
  0x11   : > { %s242_s28 = sadd.s32 %s930_s27, %s240_s25  ;;  %248 = sbr.rel (%p932_p7) target bundleno = 265 (0x109), region = 44 }
  0x12   : > { %s1403_s6 = scalar_lea.vmem %s1731_s0, %s1251_s26  ;;  %s931_s7 = sshll.u32 %s242_s28, 3 }
  0x13   : > { %s1408_s10 = scalar_lea.vmem %s1736_s5, %s931_s7 }
  0x16   : > { %v941_v0 = vld [vmem:[%s1732_s1 + $0x88] sm:$0xff]  ;;  %v259_v1 = vld [vmem:[%s1732_s1 + $0x40] sm:$0xff]  ;;  %v258_v3 = vld [vmem:[%s1732_s1 + $0x38] sm:$0xff]  ;;  %vm272_vm0 = vcmask 588800   ;;  %v543_v35 = vlaneseq }
  0x17   : > { %v940_v2 = vld [vmem:[%s1732_s1 + $0x80] sm:$0xff]  ;;  %1083 = vmatprep.subr.mxu0 %v941_v0  ;;  %1104 = vmatprep.subr.mxu1 %v259_v1  ;;  %v939_v4 = vld [vmem:[%s1732_s1 + $0x78] sm:$0xff]  ;;  %v257_v5 = vld [vmem:[%s1732_s1 + $0x30] sm:$0xff] }
  0x18   : > { %1084 = vmatpush3.msra.mxu0 %v941_v0  ;;  %1105 = vmatpush3.msra.mxu1 %v259_v1  ;;  %v938_v6 = vld [vmem:[%s1732_s1 + $0x70] sm:$0xff]  ;;  %v256_v7 = vld [vmem:[%s1732_s1 + $0x28] sm:$0xff]  ;;  %v255_v9 = vld [vmem:[%s1732_s1 + $0x20] sm:$0xff]  ;;  %v544_v39 = vshrl.u32 %v543_v35, 7 }
  0x19   : > { %1085 = vmatprep.subr.mxu0 %v940_v2  ;;  %1106 = vmatprep.subr.mxu1 %v258_v3  ;;  %v937_v8 = vld [vmem:[%s1732_s1 + $0x68] sm:$0xff]  ;;  %v936_v10 = vld [vmem:[%s1732_s1 + $0x60] sm:$0xff]  ;;  %v254_v11 = vld [vmem:[%s1732_s1 + $0x18] sm:$0xff] }
  0x1a   : > { %1086 = vmatpush3.msra.mxu0 %v940_v2  ;;  %1107 = vmatpush3.msra.mxu1 %v258_v3  ;;  %v935_v12 = vld [vmem:[%s1732_s1 + $0x58] sm:$0xff]  ;;  %v253_v13 = vld [vmem:[%s1732_s1 + $0x10] sm:$0xff]  ;;  %v252_v15 = vld [vmem:[%s1732_s1 + $0x8] sm:$0xff]  ;;  %v550_v46 = vsub.s32 7, %v544_v39  ;;  %v545_v50 = vsub.s32 0, %v544_v39 }
  0x1b   : > { %1087 = vmatprep.subr.mxu0 %v939_v4  ;;  %1108 = vmatprep.subr.mxu1 %v257_v5  ;;  %v934_v14 = vld [vmem:[%s1732_s1 + $0x50] sm:$0xff]  ;;  %v933_v16 = vld [vmem:[%s1732_s1 + $0x48] sm:$0xff]  ;;  %v251_v17 = vld [vmem:[%s1732_s1] sm:$0xff] }
  0x1c   : > { %1088 = vmatpush3.msra.mxu0 %v939_v4  ;;  %1109 = vmatpush3.msra.mxu1 %v257_v5  ;;  %v260_v18 = vld [vmem:[%s1403_s6 + $0x1] sm:$0xff]  ;;  %v261_v20 = vld [vmem:[%s1403_s6 + $0x9] sm:$0xff]  ;;  %v951_v26 = vld [vmem:[%s1732_s1 + $0xb8] sm:$0xff] }
  0x1d   : > { %1089 = vmatprep.subr.mxu0 %v938_v6  ;;  %1110 = vmatprep.subr.mxu1 %v256_v7  ;;  %v249_v19 = vld [vmem:[%s1403_s6] sm:$0xff]  ;;  %v250_v21 = vld [vmem:[%s1403_s6 + $0x8] sm:$0xff]  ;;  %v954_v22 = vld [vmem:[%s1732_s1 + $0xd0] sm:$0xff] }
  0x1e   : > { %1090 = vmatpush3.msra.mxu0 %v938_v6  ;;  %1111 = vmatpush3.msra.mxu1 %v256_v7  ;;  %v435_v23 = vld [vmem:[%s1403_s6 + $0x2] sm:$0xff]  ;;  %v950_v27 = vld [vmem:[%s1732_s1 + $0xb0] sm:$0xff]  ;;  %v947_v30 = vld [vmem:[%s1732_s1 + $0x98] sm:$0xff] }
  0x1f   : > { %1091 = vmatprep.subr.mxu0 %v937_v8  ;;  %1112 = vmatprep.subr.mxu1 %v255_v9  ;;  %v953_v24 = vld [vmem:[%s1732_s1 + $0xc8] sm:$0xff]  ;;  %v952_v25 = vld [vmem:[%s1732_s1 + $0xc0] sm:$0xff]  ;;  %v946_v31 = vld [vmem:[%s1732_s1 + $0x90] sm:$0xff] }
  0x20   : > { %1092 = vmatpush3.msra.mxu0 %v937_v8  ;;  %1113 = vmatpush3.msra.mxu1 %v255_v9  ;;  %v949_v28 = vld [vmem:[%s1732_s1 + $0xa8] sm:$0xff]  ;;  %v948_v29 = vld [vmem:[%s1732_s1 + $0xa0] sm:$0xff] }
  0x21   : > { %1093 = vmatprep.subr.mxu0 %v936_v10  ;;  %1114 = vmatprep.subr.mxu1 %v254_v11  ;;  %v436_v32 = vld [vmem:[%s1403_s6 + $0xa] sm:$0xff]  ;;  %v957_v41 = vld [vmem:[%s1733_s2] ss:$0 sm:$0xff] }
  0x22   : > { %1094 = vmatpush3.msra.mxu0 %v936_v10  ;;  %1115 = vmatpush3.msra.mxu1 %v254_v11 }
  0x23   : > { %1095 = vmatprep.subr.mxu0 %v935_v12  ;;  %1116 = vmatprep.subr.mxu1 %v253_v13 }
  0x24   : > { %1096 = vmatpush3.msra.mxu0 %v935_v12  ;;  %1117 = vmatpush3.msra.mxu1 %v253_v13 }
  0x25   : > { %1097 = vmatprep.subr.mxu0 %v934_v14  ;;  %1118 = vmatprep.subr.mxu1 %v252_v15 }
  0x26   : > { %1098 = vmatpush3.msra.mxu0 %v934_v14  ;;  %1119 = vmatpush3.msra.mxu1 %v252_v15 }
  0x27   : > { %1099 = vmatprep.subr.mxu0 %v933_v16  ;;  %1120 = vmatprep.subr.mxu1 %v251_v17 }
  0x28   : > { %1100 = vmatpush3.msra.mxu0 %v933_v16  ;;  %1101 = vmatprep.mubr.msk.f32.mxu0 %vm272_vm0, %v260_v18 }
  0x29   : > { %1121 = vmatpush3.msra.mxu1 %v251_v17  ;;  %1122 = vmatprep.mubr.msk.f32.mxu1 %vm272_vm0, %v249_v19 }
  0x2a   : > { %1102 = vmatmul.mubr.msk.f32.vlgmr.msra.gmra.mxu0 %vm272_vm0, %v261_v20  ;;  %1123 = vmatmul.mubr.msk.f32.vlgmr.msra.gmra.mxu1 %vm272_vm0, %v250_v21 }
  0x2b   : > { %1125 = vmatprep.subr.mxu0 %v954_v22  ;;  %1143 = vmatprep.mubr.msk.f32.mxu0 %vm272_vm0, %v435_v23 }
  0x2c   : > { %1126 = vmatpush3.msra.mxu0 %v954_v22 }
  0x2d   : > { %1127 = vmatprep.subr.mxu0 %v953_v24 }
  0x2e   : > { %1128 = vmatpush3.msra.mxu0 %v953_v24 }
  0x2f   : > { %1129 = vmatprep.subr.mxu0 %v952_v25 }
  0x30   : > { %1130 = vmatpush3.msra.mxu0 %v952_v25 }
  0x31   : > { %1131 = vmatprep.subr.mxu0 %v951_v26 }
  0x32   : > { %1132 = vmatpush3.msra.mxu0 %v951_v26 }
  0x33   : > { %1133 = vmatprep.subr.mxu0 %v950_v27 }
  0x34   : > { %1134 = vmatpush3.msra.mxu0 %v950_v27 }
  0x35   : > { %1135 = vmatprep.subr.mxu0 %v949_v28 }
  0x36   : > { %1136 = vmatpush3.msra.mxu0 %v949_v28 }
  0x37   : > { %1137 = vmatprep.subr.mxu0 %v948_v29 }
  0x38   : > { %1138 = vmatpush3.msra.mxu0 %v948_v29 }
  0x39   : > { %1139 = vmatprep.subr.mxu0 %v947_v30 }
  0x3a   : > { %1140 = vmatpush3.msra.mxu0 %v947_v30 }
  0x3b   : > { %1141 = vmatprep.subr.mxu0 %v946_v31 }
  0x3c   : > { %1142 = vmatpush3.msra.mxu0 %v946_v31 }
  0x3d   : > { %1144 = vmatmul.mubr.msk.f32.vlgmr.msra.gmra.mxu0 %vm272_vm0, %v436_v32 }
  0xea   : > { %v1103_v33 = vpop.f32.mrf.mxu0  ;;  %v1124_v34 = vpop.f32.mrf.mxu1 }
  0xeb   : > { %v432_v38 = vadd.f32 %v1124_v34, %v1103_v33 }
  0xec   : > { %v345_v36 = vpop.f32.mrf.mxu0  ;;  %v426_v37 = vpop.f32.mrf.mxu1 }
  0xed   : > { %v427_v42 = vadd.f32 %v426_v37, %v345_v36 }
  0xfd   : > { %v1145_v40 = vpop.f32.mrf.mxu0 }
  0xfe   : > { %v529_v43 = vadd.f32 %v1145_v40, %v432_v38 }
  0xff   : > { %v519_v44 = vpop.f32.mrf.mxu0 }
 0x100   : > { %v538_v45 = vadd.f32 %v957_v41, %v529_v43  ;;  %v528_v47 = vadd.f32 %v519_v44, %v427_v42 }
 0x102   : > { %v540_v48 = vmax.f32 %v538_v45, 0.0  ;;  %v537_v49 = vadd.f32 %v957_v41, %v528_v47 }
 0x104   : > { %542 = vst [vmem:[#allocation2 + $0x10] sm:$0xff] %v540_v48  ;;  %v551_v51 = vrot.slane %v540_v48, %v550_v46  ;;  %v539_v52 = vmax.f32 %v537_v49, 0.0 }
 0x106   : > { %552 = vst [vmem:[#allocation2 + $0x18] sm:$0xff] %v551_v51  ;;  %541 = vst [vmem:[#allocation2 + $0x8] sm:$0xff] %v539_v52  ;;  %v546_v53 = vrot.slane %v539_v52, %v545_v50 }
 0x108   : > { %547 = vst [vmem:[#allocation2] sm:$0xff] %v546_v53 }
 0x109 PF: > { %v977_v54 = vld [vmem:[%s1734_s3 + $0xf8] sm:$0xff]  ;;  %v1334_v56 = vmov 0.0   ;;  %v976_v57 = vld [vmem:[%s1734_s3 + $0xf0] sm:$0xff]  ;;  %v975_v59 = vld [vmem:[%s1734_s3 + $0xe8] sm:$0xff]  ;;  %s958_s14 = sshll.u32 %s1316_s18, 3  ;;  %vm1335_vm1 = vmmov 0  }
 0x10a   : > { %v572_v55 = vld [vmem:[%s1734_s3 + $0x78] sm:$0xff]  ;;  %1146 = vmatprep.subr.mxu0 %v1334_v56  ;;  %1181 = vmatprep.subr.mxu1 %v1334_v56  ;;  %v571_v58 = vld [vmem:[%s1734_s3 + $0x70] sm:$0xff]  ;;  %v570_v60 = vld [vmem:[%s1734_s3 + $0x68] sm:$0xff]  ;;  %s1631_s29 = scalar_lea.vmem [#allocation2], %s958_s14 }
 0x10b   : > { %1147 = vmatpush3.msra.mxu0 %v977_v54  ;;  %1182 = vmatpush3.msra.mxu1 %v572_v55  ;;  %v974_v61 = vld [vmem:[%s1734_s3 + $0xe0] sm:$0xff]  ;;  %v973_v63 = vld [vmem:[%s1734_s3 + $0xd8] sm:$0xff]  ;;  %v972_v1 = vld [vmem:[%s1734_s3 + $0xd0] sm:$0xff] }
 0x10c   : > { %1148 = vmatprep.subr.mxu0 %v1334_v56  ;;  %1183 = vmatprep.subr.mxu1 %v1334_v56  ;;  %v569_v62 = vld [vmem:[%s1734_s3 + $0x60] sm:$0xff]  ;;  %v568_v0 = vld [vmem:[%s1734_s3 + $0x58] sm:$0xff]  ;;  %v567_v2 = vld [vmem:[%s1734_s3 + $0x50] sm:$0xff] }
 0x10d   : > { %1149 = vmatpush3.msra.mxu0 %v976_v57  ;;  %1184 = vmatpush3.msra.mxu1 %v571_v58  ;;  %v971_v3 = vld [vmem:[%s1734_s3 + $0xc8] sm:$0xff]  ;;  %v970_v5 = vld [vmem:[%s1734_s3 + $0xc0] sm:$0xff]  ;;  %v969_v7 = vld [vmem:[%s1734_s3 + $0xb8] sm:$0xff] }
 0x10e   : > { %1150 = vmatprep.subr.mxu0 %v1334_v56  ;;  %1185 = vmatprep.subr.mxu1 %v1334_v56  ;;  %v566_v4 = vld [vmem:[%s1734_s3 + $0x48] sm:$0xff]  ;;  %v565_v6 = vld [vmem:[%s1734_s3 + $0x40] sm:$0xff]  ;;  %v564_v8 = vld [vmem:[%s1734_s3 + $0x38] sm:$0xff] }
 0x10f   : > { %1151 = vmatpush3.msra.mxu0 %v975_v59  ;;  %1186 = vmatpush3.msra.mxu1 %v570_v60  ;;  %v968_v9 = vld [vmem:[%s1734_s3 + $0xb0] sm:$0xff]  ;;  %v967_v11 = vld [vmem:[%s1734_s3 + $0xa8] sm:$0xff]  ;;  %v966_v13 = vld [vmem:[%s1734_s3 + $0xa0] sm:$0xff] }
 0x110   : > { %1152 = vmatprep.subr.mxu0 %v1334_v56  ;;  %1187 = vmatprep.subr.mxu1 %v1334_v56  ;;  %v563_v10 = vld [vmem:[%s1734_s3 + $0x30] sm:$0xff]  ;;  %v562_v12 = vld [vmem:[%s1734_s3 + $0x28] sm:$0xff]  ;;  %v561_v14 = vld [vmem:[%s1734_s3 + $0x20] sm:$0xff] }
 0x111   : > { %1153 = vmatpush3.msra.mxu0 %v974_v61  ;;  %1188 = vmatpush3.msra.mxu1 %v569_v62  ;;  %v965_v15 = vld [vmem:[%s1734_s3 + $0x98] sm:$0xff]  ;;  %v964_v17 = vld [vmem:[%s1734_s3 + $0x90] sm:$0xff]  ;;  %v963_v19 = vld [vmem:[%s1734_s3 + $0x88] sm:$0xff] }
 0x112   : > { %1154 = vmatprep.subr.mxu0 %v1334_v56  ;;  %1189 = vmatprep.subr.mxu1 %v1334_v56  ;;  %v560_v16 = vld [vmem:[%s1734_s3 + $0x18] sm:$0xff]  ;;  %v559_v18 = vld [vmem:[%s1734_s3 + $0x10] sm:$0xff]  ;;  %v558_v20 = vld [vmem:[%s1734_s3 + $0x8] sm:$0xff] }
 0x113   : > { %1155 = vmatpush3.msra.mxu0 %v973_v63  ;;  %1190 = vmatpush3.msra.mxu1 %v568_v0  ;;  %v962_v21 = vld [vmem:[%s1734_s3 + $0x80] sm:$0xff]  ;;  %v1634_v22 = vld [vmem:[%s1631_s29 + $0x8] sm:$0xff]  ;;  %v995_v25 = vld [vmem:[%s1734_s3 + $0x178] sm:$0xff] }
 0x114   : > { %1156 = vmatprep.subr.mxu0 %v1334_v56  ;;  %1191 = vmatprep.subr.mxu1 %v1334_v56  ;;  %v557_v23 = vld [vmem:[%s1734_s3] sm:$0xff]  ;;  %v994_v26 = vld [vmem:[%s1734_s3 + $0x170] sm:$0xff]  ;;  %v993_v27 = vld [vmem:[%s1734_s3 + $0x168] sm:$0xff] }
 0x115   : > { %1157 = vmatpush3.msra.mxu0 %v972_v1  ;;  %1192 = vmatpush3.msra.mxu1 %v567_v2  ;;  %v959_v24 = vld [vmem:[%s1631_s29 + $0x7] sm:$0xff]  ;;  %v991_v29 = vld [vmem:[%s1734_s3 + $0x158] sm:$0xff]  ;;  %v990_v30 = vld [vmem:[%s1734_s3 + $0x150] sm:$0xff] }
 0x116   : > { %1158 = vmatprep.subr.mxu0 %v1334_v56  ;;  %1193 = vmatprep.subr.mxu1 %v1334_v56  ;;  %v992_v28 = vld [vmem:[%s1734_s3 + $0x160] sm:$0xff]  ;;  %v989_v31 = vld [vmem:[%s1734_s3 + $0x148] sm:$0xff]  ;;  %v987_v33 = vld [vmem:[%s1734_s3 + $0x138] sm:$0xff] }
 0x117   : > { %1159 = vmatpush3.msra.mxu0 %v971_v3  ;;  %1194 = vmatpush3.msra.mxu1 %v566_v4  ;;  %v988_v32 = vld [vmem:[%s1734_s3 + $0x140] sm:$0xff]  ;;  %v986_v34 = vld [vmem:[%s1734_s3 + $0x130] sm:$0xff]  ;;  %v985_v35 = vld [vmem:[%s1734_s3 + $0x128] sm:$0xff] }
 0x118   : > { %1160 = vmatprep.subr.mxu0 %v1334_v56  ;;  %1195 = vmatprep.subr.mxu1 %v1334_v56  ;;  %v984_v36 = vld [vmem:[%s1734_s3 + $0x120] sm:$0xff]  ;;  %v983_v37 = vld [vmem:[%s1734_s3 + $0x118] sm:$0xff]  ;;  %v982_v38 = vld [vmem:[%s1734_s3 + $0x110] sm:$0xff] }
 0x119   : > { %1161 = vmatpush3.msra.mxu0 %v970_v5  ;;  %1196 = vmatpush3.msra.mxu1 %v565_v6  ;;  %v981_v39 = vld [vmem:[%s1734_s3 + $0x108] sm:$0xff]  ;;  %v980_v40 = vld [vmem:[%s1734_s3 + $0x100] sm:$0xff] }
 0x11a   : > { %1162 = vmatprep.subr.mxu0 %v1334_v56  ;;  %1197 = vmatprep.subr.mxu1 %v1334_v56  ;;  %v979_v41 = vld [vmem:[%s1631_s29 + $0x9] sm:$0xff]  ;;  %v996_v48 = vld [vmem:[%s1735_s4] ss:$0 sm:$0xff] }
 0x11b   : > { %1163 = vmatpush3.msra.mxu0 %v969_v7  ;;  %1198 = vmatpush3.msra.mxu1 %v564_v8 }
 0x11c   : > { %1164 = vmatprep.subr.mxu0 %v1334_v56  ;;  %1199 = vmatprep.subr.mxu1 %v1334_v56 }
 0x11d   : > { %1165 = vmatpush3.msra.mxu0 %v968_v9  ;;  %1200 = vmatpush3.msra.mxu1 %v563_v10 }
 0x11e   : > { %1166 = vmatprep.subr.mxu0 %v1334_v56  ;;  %1201 = vmatprep.subr.mxu1 %v1334_v56 }
 0x11f   : > { %1167 = vmatpush3.msra.mxu0 %v967_v11  ;;  %1202 = vmatpush3.msra.mxu1 %v562_v12 }
 0x120   : > { %1168 = vmatprep.subr.mxu0 %v1334_v56  ;;  %1203 = vmatprep.subr.mxu1 %v1334_v56 }
 0x121   : > { %1169 = vmatpush3.msra.mxu0 %v966_v13  ;;  %1204 = vmatpush3.msra.mxu1 %v561_v14 }
 0x122   : > { %1170 = vmatprep.subr.mxu0 %v1334_v56  ;;  %1205 = vmatprep.subr.mxu1 %v1334_v56 }
 0x123   : > { %1171 = vmatpush3.msra.mxu0 %v965_v15  ;;  %1206 = vmatpush3.msra.mxu1 %v560_v16 }
 0x124   : > { %1172 = vmatprep.subr.mxu0 %v1334_v56  ;;  %1207 = vmatprep.subr.mxu1 %v1334_v56 }
 0x125   : > { %1173 = vmatpush3.msra.mxu0 %v964_v17  ;;  %1208 = vmatpush3.msra.mxu1 %v559_v18 }
 0x126   : > { %1174 = vmatprep.subr.mxu0 %v1334_v56  ;;  %1209 = vmatprep.subr.mxu1 %v1334_v56 }
 0x127   : > { %1175 = vmatpush3.msra.mxu0 %v963_v19  ;;  %1210 = vmatpush3.msra.mxu1 %v558_v20 }
 0x128   : > { %1176 = vmatprep.subr.mxu0 %v1334_v56  ;;  %1178 = vmatprep.mubr.msk.f32.mxu0 %vm1335_vm1, %v1334_v56 }
 0x129   : > { %1177 = vmatpush3.msra.mxu0 %v962_v21  ;;  %1211 = vmatprep.subr.mxu1 %v1334_v56 }
 0x12a   : > { %1179 = vmatmul.mubr.f32.vlgmr.msra.gmra.mxu0 %v1634_v22  ;;  %1212 = vmatpush3.msra.mxu1 %v557_v23 }
 0x12b   : > { %1213 = vmatprep.mubr.msk.f32.mxu1 %vm1335_vm1, %v1334_v56  ;;  %1216 = vmatprep.subr.mxu0 %v1334_v56 }
 0x12c   : > { %1214 = vmatmul.mubr.f32.vlgmr.msra.gmra.mxu1 %v959_v24  ;;  %1217 = vmatpush3.msra.mxu0 %v995_v25 }
 0x12d   : > { %1218 = vmatprep.subr.mxu0 %v1334_v56  ;;  %1248 = vmatprep.mubr.msk.f32.mxu0 %vm1335_vm1, %v1334_v56 }
 0x12e   : > { %1219 = vmatpush3.msra.mxu0 %v994_v26 }
 0x12f   : > { %1220 = vmatprep.subr.mxu0 %v1334_v56 }
 0x130   : > { %1221 = vmatpush3.msra.mxu0 %v993_v27 }
 0x131   : > { %1222 = vmatprep.subr.mxu0 %v1334_v56 }
 0x132   : > { %1223 = vmatpush3.msra.mxu0 %v992_v28 }
 0x133   : > { %1224 = vmatprep.subr.mxu0 %v1334_v56 }
 0x134   : > { %1225 = vmatpush3.msra.mxu0 %v991_v29 }
 0x135   : > { %1226 = vmatprep.subr.mxu0 %v1334_v56 }
 0x136   : > { %1227 = vmatpush3.msra.mxu0 %v990_v30 }
 0x137   : > { %1228 = vmatprep.subr.mxu0 %v1334_v56 }
 0x138   : > { %1229 = vmatpush3.msra.mxu0 %v989_v31 }
 0x139   : > { %1230 = vmatprep.subr.mxu0 %v1334_v56 }
 0x13a   : > { %1231 = vmatpush3.msra.mxu0 %v988_v32 }
 0x13b   : > { %1232 = vmatprep.subr.mxu0 %v1334_v56 }
 0x13c   : > { %1233 = vmatpush3.msra.mxu0 %v987_v33 }
 0x13d   : > { %1234 = vmatprep.subr.mxu0 %v1334_v56 }
 0x13e   : > { %1235 = vmatpush3.msra.mxu0 %v986_v34 }
 0x13f   : > { %1236 = vmatprep.subr.mxu0 %v1334_v56 }
 0x140   : > { %1237 = vmatpush3.msra.mxu0 %v985_v35 }
 0x141   : > { %1238 = vmatprep.subr.mxu0 %v1334_v56 }
 0x142   : > { %1239 = vmatpush3.msra.mxu0 %v984_v36 }
 0x143   : > { %1240 = vmatprep.subr.mxu0 %v1334_v56 }
 0x144   : > { %1241 = vmatpush3.msra.mxu0 %v983_v37 }
 0x145   : > { %1242 = vmatprep.subr.mxu0 %v1334_v56 }
 0x146   : > { %1243 = vmatpush3.msra.mxu0 %v982_v38 }
 0x147   : > { %1244 = vmatprep.subr.mxu0 %v1334_v56 }
 0x148   : > { %1245 = vmatpush3.msra.mxu0 %v981_v39 }
 0x149   : > { %1246 = vmatprep.subr.mxu0 %v1334_v56 }
 0x14a   : > { %1247 = vmatpush3.msra.mxu0 %v980_v40 }
 0x14b   : > { %1249 = vmatmul.mubr.f32.vlgmr.msra.gmra.mxu0 %v979_v41 }
 0x1ea   : > { %v659_v42 = vpop.f32.mrf.mxu0 }
 0x1ec   : > { %v729_v43 = vpop.f32.mrf.mxu1  ;;  %v1180_v44 = vpop.f32.mrf.mxu0 }
 0x1ed   : > { %v730_v46 = vadd.f32 %v729_v43, %v659_v42 }
 0x1ee   : > { %v1215_v45 = vpop.f32.mrf.mxu1 }
 0x20b   : > { %v819_v47 = vpop.f32.mrf.mxu0 }
 0x20c   : > { %v823_v49 = vadd.f32 %v819_v47, %v730_v46 }
 0x20d   : > { %v1250_v50 = vpop.f32.mrf.mxu0 }
 0x20e   : > { %v831_v51 = vadd.f32 %v996_v48, %v823_v49 }
 0x210   : > { %v832_v52 = vmax.f32 %v831_v51, 0.0 }
 0x212   : > { %v833_v53 = vadd.f32 %v1634_v22, %v832_v52 }
 0x214   : > { %834 = vst [vmem:[%s1408_s10] sm:$0xff] %v833_v53 }
 0x215 PF: > { %s15_s22 = sadd.s32 1, %s1332_s22   ;;  %s1737_s18 = smov %s1324_s20 }
 0x216   : > { %p12_p8 = scmp.ge.s32.totalorder %s15_s22, 6   ;;  %s1738_s19 = smov %s1328_s21 }
 0x217   : > { %s1739_s20 = smov %s1742_s23  ;;  %s1740_s21 = smov %s1746_s24 }
 0x218   :  { %14 = sbr.rel (!%p12_p8) target bundleno = 3 (0x3), region = 81 }

</bundles_post_ra>
